<compile_context>
chip_gen: v7x
topology: tpu7x:2x2x1
jax: 0.10.0
libtpu: 0.0.40
codegen_flags: <defaults>
</compile_context>

<pallas_src>
import numpy as np
import jax
import jax.numpy as jnp
from jax.experimental import pallas as pl
from jax.experimental.pallas import tpu as pltpu


def rgb_extractor_kernel(rgb_ref, x_ref, zp_ref, y_ref, f_ref):
    # rgb_ref : SMEM (3, w_ceil)                      filter taps (scalars)
    # x_ref   : VMEM (1, w_ceil, H_tile, W)           1x1-conv input block
    # zp_ref  : VMEM (1, 1, H_tile, W + w_ceil - 1)   left-zero-padded z block
    # y_ref   : VMEM (1, 3, H_tile, W)
    # f_ref   : VMEM (1, 3, H_tile, W)
    w_ceil = x_ref.shape[1]
    W = x_ref.shape[3]
    pad = zp_ref.shape[3] - W  # == w_ceil - 1

    zp = zp_ref[0, 0]                                    # (H_tile, W + pad)
    # Hoist the channel loads / causal shifts out of the output-channel loop.
    xs = [x_ref[0, j] for j in range(w_ceil)]            # each (H_tile, W)
    zs = [zp[:, pad - j: pad - j + W] for j in range(w_ceil)]  # z shifted right by j

    for o in range(3):
        c0 = rgb_ref[o, 0]
        y_acc = c0 * xs[0]
        f_acc = c0 * zs[0]
        for j in range(1, w_ceil):
            c = rgb_ref[o, j]
            y_acc = y_acc + c * xs[j]
            f_acc = f_acc + c * zs[j]
        y_ref[0, o] = y_acc
        f_ref[0, o] = f_acc


def _pick_h_tile(H, W, w_ceil, budget_bytes=16 * 1024 * 1024):
    """Largest H tile (multiple of 8, or full H) whose double-buffered
    f32 working set (x + z + y + f blocks) stays under `budget_bytes`."""
    lane_w = max(W, 128)  # lanes are padded to 128 in VMEM
    bytes_per_row = 2 * (w_ceil + 1 + 3 + 3) * lane_w * 4
    max_rows = max(8, (budget_bytes // bytes_per_row) // 8 * 8)
    if H <= max_rows:
        return H            # full dim -> always a legal block shape
    return max_rows         # multiple of 8 -> legal second-to-last block dim


def make_rgb_param(w_ceil: int, w: float) -> jnp.ndarray:
    """Deterministic init matching RGBExtractor_fixed.__init__ (shape (3, w_ceil, 1, 1))."""
    RGB = np.zeros((3, w_ceil, 1, 1), np.float32)
    RGB[0, int(np.round(w / 4)), 0, 0] = 1.0
    RGB[1, int(np.round(w / 2)), 0, 0] = 1.0
    RGB[2, int(np.round(3 * w / 4)), 0, 0] = 1.0
    return jnp.asarray(RGB)


def rgb_extractor_forward(x_exp, z, RGB, w_ceil: int):
    N, C, H, W = x_exp.shape
    Nz, Cz, Hz, Wz = z.shape
    assert C == w_ceil and Cz == 1 and (Nz, Hz, Wz) == (N, H, W)

    pad = w_ceil - 1
    rgb2d = RGB.reshape(3, w_ceil).astype(jnp.float32)            # (3, w_ceil) taps -> SMEM
    x_f32 = x_exp.astype(jnp.float32)
    # Left-pad z along width once so the in-kernel causal shifts are plain
    # static lane slices (no lane concat/rotate in the kernel).
    z_pad = jnp.pad(z.astype(jnp.float32), ((0, 0), (0, 0), (0, 0), (pad, 0)))

    H_tile = _pick_h_tile(H, W, w_ceil)
    grid = (N, pl.cdiv(H, H_tile))

    y, f = pl.pallas_call(
        rgb_extractor_kernel,
        out_shape=(
            jax.ShapeDtypeStruct((N, 3, H, W), jnp.float32),
            jax.ShapeDtypeStruct((N, 3, H, W), jnp.float32),
        ),
        grid=grid,
        in_specs=[
            pl.BlockSpec(memory_space=pltpu.MemorySpace.SMEM),               # rgb taps (whole, resident)
            pl.BlockSpec((1, w_ceil, H_tile, W), lambda n, h: (n, 0, h, 0)),  # x block
            pl.BlockSpec((1, 1, H_tile, W + pad), lambda n, h: (n, 0, h, 0)),  # padded z block
        ],
        out_specs=(
            pl.BlockSpec((1, 3, H_tile, W), lambda n, h: (n, 0, h, 0)),
            pl.BlockSpec((1, 3, H_tile, W), lambda n, h: (n, 0, h, 0)),
        ),
        compiler_params=pltpu.CompilerParams(
            dimension_semantics=("parallel", "parallel"),
            vmem_limit_bytes=32 * 1024 * 1024,
        ),
    )(rgb2d, x_f32, z_pad)
    return y, f


def _reference(x_exp, z, RGB, w_ceil):
    """Pure numpy reference matching the PyTorch forward exactly."""
    x = np.asarray(x_exp, np.float32)
    zz = np.asarray(z, np.float32)[:, 0]                          # (N, H, W)
    rgb = np.asarray(RGB, np.float32).reshape(3, w_ceil)
    # y = 1x1 conv
    y = np.einsum('oc,nchw->nohw', rgb, x)
    # causal conv along width
    N, H, W = zz.shape
    f = np.zeros((N, 3, H, W), np.float32)
    for j in range(w_ceil):
        zshift = np.zeros_like(zz)
        zshift[..., j:] = zz[..., :W - j] if j > 0 else zz
        f += rgb[:, j][None, :, None, None] * zshift[:, None, :, :]
    return y, f


if __name__ == "__main__":
    w_ceil, w = 8, 7.0
    N, H, W = 2, 8, 16

    key = jax.random.PRNGKey(0)
    k1, k2, k3 = jax.random.split(key, 3)
    x_exp = jax.random.normal(k1, (N, w_ceil, H, W), dtype=jnp.float32)
    z = jax.random.normal(k2, (N, 1, H, W), dtype=jnp.float32)

    # (a) the module's deterministic RGB init
    RGB = make_rgb_param(w_ceil, w)
    y, rgb_filter_image = rgb_extractor_forward(x_exp, z, RGB, w_ceil)
    y = jax.block_until_ready(y)
    rgb_filter_image = jax.block_until_ready(rgb_filter_image)
    y_ref, f_ref = _reference(x_exp, z, RGB, w_ceil)
    np.testing.assert_allclose(np.asarray(y), y_ref, rtol=1e-5, atol=1e-5)
    np.testing.assert_allclose(np.asarray(rgb_filter_image), f_ref, rtol=1e-5, atol=1e-5)

    # (b) random taps (exercises every causal shift j = 0..w_ceil-1, as after autotune)
    RGB_rand = jax.random.normal(k3, (3, w_ceil, 1, 1), dtype=jnp.float32)
    y2, f2 = rgb_extractor_forward(x_exp, z, RGB_rand, w_ceil)
    y2 = jax.block_until_ready(y2)
    f2 = jax.block_until_ready(f2)
    y2_ref, f2_ref = _reference(x_exp, z, RGB_rand, w_ceil)
    np.testing.assert_allclose(np.asarray(y2), y2_ref, rtol=1e-5, atol=1e-5)
    np.testing.assert_allclose(np.asarray(f2), f2_ref, rtol=1e-5, atol=1e-5)

    print("KERNEL_OK")
</pallas_src>

<mosaic_0001>
module attributes {stable_mosaic.version = 11 : i64} {
  func.func @rgb_extractor_kernel(%arg0: i32, %arg1: i32, %arg2: memref<3x8xf32, #tpu.memory_space<smem>>, %arg3: memref<1x8x8x16xf32, #tpu.memory_space<vmem>>, %arg4: memref<1x1x8x23xf32, #tpu.memory_space<vmem>>, %arg5: memref<1x3x8x16xf32, #tpu.memory_space<vmem>>, %arg6: memref<1x3x8x16xf32, #tpu.memory_space<vmem>>) attributes {dimension_semantics = [#tpu.dimension_semantics<parallel>, #tpu.dimension_semantics<parallel>], iteration_bounds = array<i64: 2, 1>, scalar_prefetch = 0 : i64, scratch_operands = 0 : i64, tpu.core_type = #tpu.core_type<tc>, window_params = [{transform_indices = @transform_0, window_bounds = array<i64: 3, 8>}, {transform_indices = @transform_1, window_bounds = array<i64: 1, 8, 8, 16>}, {transform_indices = @transform_2, window_bounds = array<i64: 1, 1, 8, 23>}, {transform_indices = @transform_3, window_bounds = array<i64: 1, 3, 8, 16>}, {transform_indices = @transform_4, window_bounds = array<i64: 1, 3, 8, 16>}]} {
    %c0 = arith.constant 0 : index
    %c0_0 = arith.constant 0 : index
    %c0_1 = arith.constant 0 : index
    %c0_2 = arith.constant 0 : index
    %0 = vector.load %arg4[%c0, %c0_0, %c0_1, %c0_2] : memref<1x1x8x23xf32, #tpu.memory_space<vmem>>, vector<1x1x8x23xf32>
    %1 = vector.shape_cast %0 : vector<1x1x8x23xf32> to vector<8x23xf32>
    %c0_3 = arith.constant 0 : index
    %c0_4 = arith.constant 0 : index
    %c0_5 = arith.constant 0 : index
    %c0_6 = arith.constant 0 : index
    %2 = vector.load %arg3[%c0_3, %c0_4, %c0_5, %c0_6] : memref<1x8x8x16xf32, #tpu.memory_space<vmem>>, vector<1x1x8x16xf32>
    %3 = vector.shape_cast %2 : vector<1x1x8x16xf32> to vector<8x16xf32>
    %c0_7 = arith.constant 0 : index
    %c1 = arith.constant 1 : index
    %c0_8 = arith.constant 0 : index
    %c0_9 = arith.constant 0 : index
    %4 = vector.load %arg3[%c0_7, %c1, %c0_8, %c0_9] : memref<1x8x8x16xf32, #tpu.memory_space<vmem>>, vector<1x1x8x16xf32>
    %5 = vector.shape_cast %4 : vector<1x1x8x16xf32> to vector<8x16xf32>
    %c0_10 = arith.constant 0 : index
    %c2 = arith.constant 2 : index
    %c0_11 = arith.constant 0 : index
    %c0_12 = arith.constant 0 : index
    %6 = vector.load %arg3[%c0_10, %c2, %c0_11, %c0_12] : memref<1x8x8x16xf32, #tpu.memory_space<vmem>>, vector<1x1x8x16xf32>
    %7 = vector.shape_cast %6 : vector<1x1x8x16xf32> to vector<8x16xf32>
    %c0_13 = arith.constant 0 : index
    %c3 = arith.constant 3 : index
    %c0_14 = arith.constant 0 : index
    %c0_15 = arith.constant 0 : index
    %8 = vector.load %arg3[%c0_13, %c3, %c0_14, %c0_15] : memref<1x8x8x16xf32, #tpu.memory_space<vmem>>, vector<1x1x8x16xf32>
    %9 = vector.shape_cast %8 : vector<1x1x8x16xf32> to vector<8x16xf32>
    %c0_16 = arith.constant 0 : index
    %c4 = arith.constant 4 : index
    %c0_17 = arith.constant 0 : index
    %c0_18 = arith.constant 0 : index
    %10 = vector.load %arg3[%c0_16, %c4, %c0_17, %c0_18] : memref<1x8x8x16xf32, #tpu.memory_space<vmem>>, vector<1x1x8x16xf32>
    %11 = vector.shape_cast %10 : vector<1x1x8x16xf32> to vector<8x16xf32>
    %c0_19 = arith.constant 0 : index
    %c5 = arith.constant 5 : index
    %c0_20 = arith.constant 0 : index
    %c0_21 = arith.constant 0 : index
    %12 = vector.load %arg3[%c0_19, %c5, %c0_20, %c0_21] : memref<1x8x8x16xf32, #tpu.memory_space<vmem>>, vector<1x1x8x16xf32>
    %13 = vector.shape_cast %12 : vector<1x1x8x16xf32> to vector<8x16xf32>
    %c0_22 = arith.constant 0 : index
    %c6 = arith.constant 6 : index
    %c0_23 = arith.constant 0 : index
    %c0_24 = arith.constant 0 : index
    %14 = vector.load %arg3[%c0_22, %c6, %c0_23, %c0_24] : memref<1x8x8x16xf32, #tpu.memory_space<vmem>>, vector<1x1x8x16xf32>
    %15 = vector.shape_cast %14 : vector<1x1x8x16xf32> to vector<8x16xf32>
    %c0_25 = arith.constant 0 : index
    %c7 = arith.constant 7 : index
    %c0_26 = arith.constant 0 : index
    %c0_27 = arith.constant 0 : index
    %16 = vector.load %arg3[%c0_25, %c7, %c0_26, %c0_27] : memref<1x8x8x16xf32, #tpu.memory_space<vmem>>, vector<1x1x8x16xf32>
    %17 = vector.shape_cast %16 : vector<1x1x8x16xf32> to vector<8x16xf32>
    %18 = vector.extract_strided_slice %1 {offsets = [0, 7], sizes = [8, 16], strides = [1, 1]} : vector<8x23xf32> to vector<8x16xf32>
    %19 = vector.extract_strided_slice %1 {offsets = [0, 6], sizes = [8, 16], strides = [1, 1]} : vector<8x23xf32> to vector<8x16xf32>
    %20 = vector.extract_strided_slice %1 {offsets = [0, 5], sizes = [8, 16], strides = [1, 1]} : vector<8x23xf32> to vector<8x16xf32>
    %21 = vector.extract_strided_slice %1 {offsets = [0, 4], sizes = [8, 16], strides = [1, 1]} : vector<8x23xf32> to vector<8x16xf32>
    %22 = vector.extract_strided_slice %1 {offsets = [0, 3], sizes = [8, 16], strides = [1, 1]} : vector<8x23xf32> to vector<8x16xf32>
    %23 = vector.extract_strided_slice %1 {offsets = [0, 2], sizes = [8, 16], strides = [1, 1]} : vector<8x23xf32> to vector<8x16xf32>
    %24 = vector.extract_strided_slice %1 {offsets = [0, 1], sizes = [8, 16], strides = [1, 1]} : vector<8x23xf32> to vector<8x16xf32>
    %25 = vector.extract_strided_slice %1 {offsets = [0, 0], sizes = [8, 16], strides = [1, 1]} : vector<8x23xf32> to vector<8x16xf32>
    %c0_28 = arith.constant 0 : index
    %c0_29 = arith.constant 0 : index
    %26 = memref.load %arg2[%c0_28, %c0_29] : memref<3x8xf32, #tpu.memory_space<smem>>
    %27 = vector.broadcast %26 : f32 to vector<8x16xf32>
    %28 = arith.mulf %27, %3 : vector<8x16xf32>
    %29 = vector.broadcast %26 : f32 to vector<8x16xf32>
    %30 = arith.mulf %29, %18 : vector<8x16xf32>
    %c0_30 = arith.constant 0 : index
    %c1_31 = arith.constant 1 : index
    %31 = memref.load %arg2[%c0_30, %c1_31] : memref<3x8xf32, #tpu.memory_space<smem>>
    %32 = vector.broadcast %31 : f32 to vector<8x16xf32>
    %33 = arith.mulf %32, %5 : vector<8x16xf32>
    %34 = arith.addf %28, %33 : vector<8x16xf32>
    %35 = vector.broadcast %31 : f32 to vector<8x16xf32>
    %36 = arith.mulf %35, %19 : vector<8x16xf32>
    %37 = arith.addf %30, %36 : vector<8x16xf32>
    %c0_32 = arith.constant 0 : index
    %c2_33 = arith.constant 2 : index
    %38 = memref.load %arg2[%c0_32, %c2_33] : memref<3x8xf32, #tpu.memory_space<smem>>
    %39 = vector.broadcast %38 : f32 to vector<8x16xf32>
    %40 = arith.mulf %39, %7 : vector<8x16xf32>
    %41 = arith.addf %34, %40 : vector<8x16xf32>
    %42 = vector.broadcast %38 : f32 to vector<8x16xf32>
    %43 = arith.mulf %42, %20 : vector<8x16xf32>
    %44 = arith.addf %37, %43 : vector<8x16xf32>
    %c0_34 = arith.constant 0 : index
    %c3_35 = arith.constant 3 : index
    %45 = memref.load %arg2[%c0_34, %c3_35] : memref<3x8xf32, #tpu.memory_space<smem>>
    %46 = vector.broadcast %45 : f32 to vector<8x16xf32>
    %47 = arith.mulf %46, %9 : vector<8x16xf32>
    %48 = arith.addf %41, %47 : vector<8x16xf32>
    %49 = vector.broadcast %45 : f32 to vector<8x16xf32>
    %50 = arith.mulf %49, %21 : vector<8x16xf32>
    %51 = arith.addf %44, %50 : vector<8x16xf32>
    %c0_36 = arith.constant 0 : index
    %c4_37 = arith.constant 4 : index
    %52 = memref.load %arg2[%c0_36, %c4_37] : memref<3x8xf32, #tpu.memory_space<smem>>
    %53 = vector.broadcast %52 : f32 to vector<8x16xf32>
    %54 = arith.mulf %53, %11 : vector<8x16xf32>
    %55 = arith.addf %48, %54 : vector<8x16xf32>
    %56 = vector.broadcast %52 : f32 to vector<8x16xf32>
    %57 = arith.mulf %56, %22 : vector<8x16xf32>
    %58 = arith.addf %51, %57 : vector<8x16xf32>
    %c0_38 = arith.constant 0 : index
    %c5_39 = arith.constant 5 : index
    %59 = memref.load %arg2[%c0_38, %c5_39] : memref<3x8xf32, #tpu.memory_space<smem>>
    %60 = vector.broadcast %59 : f32 to vector<8x16xf32>
    %61 = arith.mulf %60, %13 : vector<8x16xf32>
    %62 = arith.addf %55, %61 : vector<8x16xf32>
    %63 = vector.broadcast %59 : f32 to vector<8x16xf32>
    %64 = arith.mulf %63, %23 : vector<8x16xf32>
    %65 = arith.addf %58, %64 : vector<8x16xf32>
    %c0_40 = arith.constant 0 : index
    %c6_41 = arith.constant 6 : index
    %66 = memref.load %arg2[%c0_40, %c6_41] : memref<3x8xf32, #tpu.memory_space<smem>>
    %67 = vector.broadcast %66 : f32 to vector<8x16xf32>
    %68 = arith.mulf %67, %15 : vector<8x16xf32>
    %69 = arith.addf %62, %68 : vector<8x16xf32>
    %70 = vector.broadcast %66 : f32 to vector<8x16xf32>
    %71 = arith.mulf %70, %24 : vector<8x16xf32>
    %72 = arith.addf %65, %71 : vector<8x16xf32>
    %c0_42 = arith.constant 0 : index
    %c7_43 = arith.constant 7 : index
    %73 = memref.load %arg2[%c0_42, %c7_43] : memref<3x8xf32, #tpu.memory_space<smem>>
    %74 = vector.broadcast %73 : f32 to vector<8x16xf32>
    %75 = arith.mulf %74, %17 : vector<8x16xf32>
    %76 = arith.addf %69, %75 : vector<8x16xf32>
    %77 = vector.broadcast %73 : f32 to vector<8x16xf32>
    %78 = arith.mulf %77, %25 : vector<8x16xf32>
    %79 = arith.addf %72, %78 : vector<8x16xf32>
    %c0_44 = arith.constant 0 : index
    %c0_45 = arith.constant 0 : index
    %c0_46 = arith.constant 0 : index
    %c0_47 = arith.constant 0 : index
    %80 = vector.load %arg5[%c0_44, %c0_45, %c0_46, %c0_47] : memref<1x3x8x16xf32, #tpu.memory_space<vmem>>, vector<1x1x8x16xf32>
    %81 = vector.shape_cast %80 : vector<1x1x8x16xf32> to vector<8x16xf32>
    %82 = vector.shape_cast %76 : vector<8x16xf32> to vector<1x1x8x16xf32>
    tpu.vector_store %arg5[%c0_44, %c0_45, %c0_46, %c0_47], %82 {strides = array<i32>} : memref<1x3x8x16xf32, #tpu.memory_space<vmem>>, vector<1x1x8x16xf32>,
    %c0_48 = arith.constant 0 : index
    %c0_49 = arith.constant 0 : index
    %c0_50 = arith.constant 0 : index
    %c0_51 = arith.constant 0 : index
    %83 = vector.load %arg6[%c0_48, %c0_49, %c0_50, %c0_51] : memref<1x3x8x16xf32, #tpu.memory_space<vmem>>, vector<1x1x8x16xf32>
    %84 = vector.shape_cast %83 : vector<1x1x8x16xf32> to vector<8x16xf32>
    %85 = vector.shape_cast %79 : vector<8x16xf32> to vector<1x1x8x16xf32>
    tpu.vector_store %arg6[%c0_48, %c0_49, %c0_50, %c0_51], %85 {strides = array<i32>} : memref<1x3x8x16xf32, #tpu.memory_space<vmem>>, vector<1x1x8x16xf32>,
    %c1_52 = arith.constant 1 : index
    %c0_53 = arith.constant 0 : index
    %86 = memref.load %arg2[%c1_52, %c0_53] : memref<3x8xf32, #tpu.memory_space<smem>>
    %87 = vector.broadcast %86 : f32 to vector<8x16xf32>
    %88 = arith.mulf %87, %3 : vector<8x16xf32>
    %89 = vector.broadcast %86 : f32 to vector<8x16xf32>
    %90 = arith.mulf %89, %18 : vector<8x16xf32>
    %c1_54 = arith.constant 1 : index
    %c1_55 = arith.constant 1 : index
    %91 = memref.load %arg2[%c1_54, %c1_55] : memref<3x8xf32, #tpu.memory_space<smem>>
    %92 = vector.broadcast %91 : f32 to vector<8x16xf32>
    %93 = arith.mulf %92, %5 : vector<8x16xf32>
    %94 = arith.addf %88, %93 : vector<8x16xf32>
    %95 = vector.broadcast %91 : f32 to vector<8x16xf32>
    %96 = arith.mulf %95, %19 : vector<8x16xf32>
    %97 = arith.addf %90, %96 : vector<8x16xf32>
    %c1_56 = arith.constant 1 : index
    %c2_57 = arith.constant 2 : index
    %98 = memref.load %arg2[%c1_56, %c2_57] : memref<3x8xf32, #tpu.memory_space<smem>>
    %99 = vector.broadcast %98 : f32 to vector<8x16xf32>
    %100 = arith.mulf %99, %7 : vector<8x16xf32>
    %101 = arith.addf %94, %100 : vector<8x16xf32>
    %102 = vector.broadcast %98 : f32 to vector<8x16xf32>
    %103 = arith.mulf %102, %20 : vector<8x16xf32>
    %104 = arith.addf %97, %103 : vector<8x16xf32>
    %c1_58 = arith.constant 1 : index
    %c3_59 = arith.constant 3 : index
    %105 = memref.load %arg2[%c1_58, %c3_59] : memref<3x8xf32, #tpu.memory_space<smem>>
    %106 = vector.broadcast %105 : f32 to vector<8x16xf32>
    %107 = arith.mulf %106, %9 : vector<8x16xf32>
    %108 = arith.addf %101, %107 : vector<8x16xf32>
    %109 = vector.broadcast %105 : f32 to vector<8x16xf32>
    %110 = arith.mulf %109, %21 : vector<8x16xf32>
    %111 = arith.addf %104, %110 : vector<8x16xf32>
    %c1_60 = arith.constant 1 : index
    %c4_61 = arith.constant 4 : index
    %112 = memref.load %arg2[%c1_60, %c4_61] : memref<3x8xf32, #tpu.memory_space<smem>>
    %113 = vector.broadcast %112 : f32 to vector<8x16xf32>
    %114 = arith.mulf %113, %11 : vector<8x16xf32>
    %115 = arith.addf %108, %114 : vector<8x16xf32>
    %116 = vector.broadcast %112 : f32 to vector<8x16xf32>
    %117 = arith.mulf %116, %22 : vector<8x16xf32>
    %118 = arith.addf %111, %117 : vector<8x16xf32>
    %c1_62 = arith.constant 1 : index
    %c5_63 = arith.constant 5 : index
    %119 = memref.load %arg2[%c1_62, %c5_63] : memref<3x8xf32, #tpu.memory_space<smem>>
    %120 = vector.broadcast %119 : f32 to vector<8x16xf32>
    %121 = arith.mulf %120, %13 : vector<8x16xf32>
    %122 = arith.addf %115, %121 : vector<8x16xf32>
    %123 = vector.broadcast %119 : f32 to vector<8x16xf32>
    %124 = arith.mulf %123, %23 : vector<8x16xf32>
    %125 = arith.addf %118, %124 : vector<8x16xf32>
    %c1_64 = arith.constant 1 : index
    %c6_65 = arith.constant 6 : index
    %126 = memref.load %arg2[%c1_64, %c6_65] : memref<3x8xf32, #tpu.memory_space<smem>>
    %127 = vector.broadcast %126 : f32 to vector<8x16xf32>
    %128 = arith.mulf %127, %15 : vector<8x16xf32>
    %129 = arith.addf %122, %128 : vector<8x16xf32>
    %130 = vector.broadcast %126 : f32 to vector<8x16xf32>
    %131 = arith.mulf %130, %24 : vector<8x16xf32>
    %132 = arith.addf %125, %131 : vector<8x16xf32>
    %c1_66 = arith.constant 1 : index
    %c7_67 = arith.constant 7 : index
    %133 = memref.load %arg2[%c1_66, %c7_67] : memref<3x8xf32, #tpu.memory_space<smem>>
    %134 = vector.broadcast %133 : f32 to vector<8x16xf32>
    %135 = arith.mulf %134, %17 : vector<8x16xf32>
    %136 = arith.addf %129, %135 : vector<8x16xf32>
    %137 = vector.broadcast %133 : f32 to vector<8x16xf32>
    %138 = arith.mulf %137, %25 : vector<8x16xf32>
    %139 = arith.addf %132, %138 : vector<8x16xf32>
    %c0_68 = arith.constant 0 : index
    %c1_69 = arith.constant 1 : index
    %c0_70 = arith.constant 0 : index
    %c0_71 = arith.constant 0 : index
    %140 = vector.load %arg5[%c0_68, %c1_69, %c0_70, %c0_71] : memref<1x3x8x16xf32, #tpu.memory_space<vmem>>, vector<1x1x8x16xf32>
    %141 = vector.shape_cast %140 : vector<1x1x8x16xf32> to vector<8x16xf32>
    %142 = vector.shape_cast %136 : vector<8x16xf32> to vector<1x1x8x16xf32>
    tpu.vector_store %arg5[%c0_68, %c1_69, %c0_70, %c0_71], %142 {strides = array<i32>} : memref<1x3x8x16xf32, #tpu.memory_space<vmem>>, vector<1x1x8x16xf32>,
    %c0_72 = arith.constant 0 : index
    %c1_73 = arith.constant 1 : index
    %c0_74 = arith.constant 0 : index
    %c0_75 = arith.constant 0 : index
    %143 = vector.load %arg6[%c0_72, %c1_73, %c0_74, %c0_75] : memref<1x3x8x16xf32, #tpu.memory_space<vmem>>, vector<1x1x8x16xf32>
    %144 = vector.shape_cast %143 : vector<1x1x8x16xf32> to vector<8x16xf32>
    %145 = vector.shape_cast %139 : vector<8x16xf32> to vector<1x1x8x16xf32>
    tpu.vector_store %arg6[%c0_72, %c1_73, %c0_74, %c0_75], %145 {strides = array<i32>} : memref<1x3x8x16xf32, #tpu.memory_space<vmem>>, vector<1x1x8x16xf32>,
    %c2_76 = arith.constant 2 : index
    %c0_77 = arith.constant 0 : index
    %146 = memref.load %arg2[%c2_76, %c0_77] : memref<3x8xf32, #tpu.memory_space<smem>>
    %147 = vector.broadcast %146 : f32 to vector<8x16xf32>
    %148 = arith.mulf %147, %3 : vector<8x16xf32>
    %149 = vector.broadcast %146 : f32 to vector<8x16xf32>
    %150 = arith.mulf %149, %18 : vector<8x16xf32>
    %c2_78 = arith.constant 2 : index
    %c1_79 = arith.constant 1 : index
    %151 = memref.load %arg2[%c2_78, %c1_79] : memref<3x8xf32, #tpu.memory_space<smem>>
    %152 = vector.broadcast %151 : f32 to vector<8x16xf32>
    %153 = arith.mulf %152, %5 : vector<8x16xf32>
    %154 = arith.addf %148, %153 : vector<8x16xf32>
    %155 = vector.broadcast %151 : f32 to vector<8x16xf32>
    %156 = arith.mulf %155, %19 : vector<8x16xf32>
    %157 = arith.addf %150, %156 : vector<8x16xf32>
    %c2_80 = arith.constant 2 : index
    %c2_81 = arith.constant 2 : index
    %158 = memref.load %arg2[%c2_80, %c2_81] : memref<3x8xf32, #tpu.memory_space<smem>>
    %159 = vector.broadcast %158 : f32 to vector<8x16xf32>
    %160 = arith.mulf %159, %7 : vector<8x16xf32>
    %161 = arith.addf %154, %160 : vector<8x16xf32>
    %162 = vector.broadcast %158 : f32 to vector<8x16xf32>
    %163 = arith.mulf %162, %20 : vector<8x16xf32>
    %164 = arith.addf %157, %163 : vector<8x16xf32>
    %c2_82 = arith.constant 2 : index
    %c3_83 = arith.constant 3 : index
    %165 = memref.load %arg2[%c2_82, %c3_83] : memref<3x8xf32, #tpu.memory_space<smem>>
    %166 = vector.broadcast %165 : f32 to vector<8x16xf32>
    %167 = arith.mulf %166, %9 : vector<8x16xf32>
    %168 = arith.addf %161, %167 : vector<8x16xf32>
    %169 = vector.broadcast %165 : f32 to vector<8x16xf32>
    %170 = arith.mulf %169, %21 : vector<8x16xf32>
    %171 = arith.addf %164, %170 : vector<8x16xf32>
    %c2_84 = arith.constant 2 : index
    %c4_85 = arith.constant 4 : index
    %172 = memref.load %arg2[%c2_84, %c4_85] : memref<3x8xf32, #tpu.memory_space<smem>>
    %173 = vector.broadcast %172 : f32 to vector<8x16xf32>
    %174 = arith.mulf %173, %11 : vector<8x16xf32>
    %175 = arith.addf %168, %174 : vector<8x16xf32>
    %176 = vector.broadcast %172 : f32 to vector<8x16xf32>
    %177 = arith.mulf %176, %22 : vector<8x16xf32>
    %178 = arith.addf %171, %177 : vector<8x16xf32>
    %c2_86 = arith.constant 2 : index
    %c5_87 = arith.constant 5 : index
    %179 = memref.load %arg2[%c2_86, %c5_87] : memref<3x8xf32, #tpu.memory_space<smem>>
    %180 = vector.broadcast %179 : f32 to vector<8x16xf32>
    %181 = arith.mulf %180, %13 : vector<8x16xf32>
    %182 = arith.addf %175, %181 : vector<8x16xf32>
    %183 = vector.broadcast %179 : f32 to vector<8x16xf32>
    %184 = arith.mulf %183, %23 : vector<8x16xf32>
    %185 = arith.addf %178, %184 : vector<8x16xf32>
    %c2_88 = arith.constant 2 : index
    %c6_89 = arith.constant 6 : index
    %186 = memref.load %arg2[%c2_88, %c6_89] : memref<3x8xf32, #tpu.memory_space<smem>>
    %187 = vector.broadcast %186 : f32 to vector<8x16xf32>
    %188 = arith.mulf %187, %15 : vector<8x16xf32>
    %189 = arith.addf %182, %188 : vector<8x16xf32>
    %190 = vector.broadcast %186 : f32 to vector<8x16xf32>
    %191 = arith.mulf %190, %24 : vector<8x16xf32>
    %192 = arith.addf %185, %191 : vector<8x16xf32>
    %c2_90 = arith.constant 2 : index
    %c7_91 = arith.constant 7 : index
    %193 = memref.load %arg2[%c2_90, %c7_91] : memref<3x8xf32, #tpu.memory_space<smem>>
    %194 = vector.broadcast %193 : f32 to vector<8x16xf32>
    %195 = arith.mulf %194, %17 : vector<8x16xf32>
    %196 = arith.addf %189, %195 : vector<8x16xf32>
    %197 = vector.broadcast %193 : f32 to vector<8x16xf32>
    %198 = arith.mulf %197, %25 : vector<8x16xf32>
    %199 = arith.addf %192, %198 : vector<8x16xf32>
    %c0_92 = arith.constant 0 : index
    %c2_93 = arith.constant 2 : index
    %c0_94 = arith.constant 0 : index
    %c0_95 = arith.constant 0 : index
    %200 = vector.load %arg5[%c0_92, %c2_93, %c0_94, %c0_95] : memref<1x3x8x16xf32, #tpu.memory_space<vmem>>, vector<1x1x8x16xf32>
    %201 = vector.shape_cast %200 : vector<1x1x8x16xf32> to vector<8x16xf32>
    %202 = vector.shape_cast %196 : vector<8x16xf32> to vector<1x1x8x16xf32>
    tpu.vector_store %arg5[%c0_92, %c2_93, %c0_94, %c0_95], %202 {strides = array<i32>} : memref<1x3x8x16xf32, #tpu.memory_space<vmem>>, vector<1x1x8x16xf32>,
    %c0_96 = arith.constant 0 : index
    %c2_97 = arith.constant 2 : index
    %c0_98 = arith.constant 0 : index
    %c0_99 = arith.constant 0 : index
    %203 = vector.load %arg6[%c0_96, %c2_97, %c0_98, %c0_99] : memref<1x3x8x16xf32, #tpu.memory_space<vmem>>, vector<1x1x8x16xf32>
    %204 = vector.shape_cast %203 : vector<1x1x8x16xf32> to vector<8x16xf32>
    %205 = vector.shape_cast %199 : vector<8x16xf32> to vector<1x1x8x16xf32>
    tpu.vector_store %arg6[%c0_96, %c2_97, %c0_98, %c0_99], %205 {strides = array<i32>} : memref<1x3x8x16xf32, #tpu.memory_space<vmem>>, vector<1x1x8x16xf32>,
    return
  }
  func.func @transform_0(%arg0: i32, %arg1: i32) -> (i32, i32) {
    %c0_i32 = arith.constant 0 : i32
    %c0_i32_0 = arith.constant 0 : i32
    %c0_i32_1 = arith.constant 0 : i32
    return %c0_i32, %c0_i32_0 : i32, i32
  }
  func.func @transform_1(%arg0: i32, %arg1: i32) -> (i32, i32, i32, i32) {
    %c0_i32 = arith.constant 0 : i32
    %c0_i32_0 = arith.constant 0 : i32
    %c0_i32_1 = arith.constant 0 : i32
    return %arg0, %c0_i32, %arg1, %c0_i32_0 : i32, i32, i32, i32
  }
  func.func @transform_2(%arg0: i32, %arg1: i32) -> (i32, i32, i32, i32) {
    %c0_i32 = arith.constant 0 : i32
    %c0_i32_0 = arith.constant 0 : i32
    %c0_i32_1 = arith.constant 0 : i32
    return %arg0, %c0_i32, %arg1, %c0_i32_0 : i32, i32, i32, i32
  }
  func.func @transform_3(%arg0: i32, %arg1: i32) -> (i32, i32, i32, i32) {
    %c0_i32 = arith.constant 0 : i32
    %c0_i32_0 = arith.constant 0 : i32
    %c0_i32_1 = arith.constant 0 : i32
    return %arg0, %c0_i32, %arg1, %c0_i32_0 : i32, i32, i32, i32
  }
  func.func @transform_4(%arg0: i32, %arg1: i32) -> (i32, i32, i32, i32) {
    %c0_i32 = arith.constant 0 : i32
    %c0_i32_0 = arith.constant 0 : i32
    %c0_i32_1 = arith.constant 0 : i32
    return %arg0, %c0_i32, %arg1, %c0_i32_0 : i32, i32, i32, i32
  }
}

</mosaic_0001>

<bundles_post_ra>
// kernel: tpu_custom_call.1
= control target key start
LH: loop header
LB: loop body
LE: loop exit
PB: predicated region body
PF: predicated region fallthrough
CT: control target
= control target key end

     0   :  { %s1553_s0 = inlined_call_operand.hbm [shape: f32[3,8], index: 0, kind: input, shape index: {}]   ;;  %s1554_s1 = inlined_call_operand.hbm [shape: f32[2,8,8,16], index: 1, kind: input, shape index: {}]   ;;  %s1555_s2 = inlined_call_operand.hbm [shape: f32[2,1,8,23], index: 2, kind: input, shape index: {}]   ;;  %s1556_s3 = inlined_call_operand.hbm [shape: f32[2,3,8,16], index: 3, kind: output, shape index: {0}]   ;;  %s1557_s4 = inlined_call_operand.hbm [shape: f32[2,3,8,16], index: 4, kind: output, shape index: {1}]  }
   0x1   :  { %1564 = sst [smem:[#allocation18_spill]] %s1553_s0 }
   0x2   :  { %1565 = sst [smem:[#allocation19_spill]] %s1554_s1 }
   0x3   :  { %10 = vsyncpa [#allocation5], 0 }
   0x4   :  { %11 = vsyncpa [#allocation3], 0 }
   0x5   :  { %13 = vsyncpa [#allocation3 + $0x1], 0 }
   0x6   :  { %14 = vsyncpa [#allocation8], 0 }
   0x7   :  { %16 = vsyncpa [#allocation8 + $0x1], 0 }
   0x8   :  { %17 = vsyncpa [#allocation4], 0 }
   0x9   :  { %19 = vsyncpa [#allocation4 + $0x1], 0 }
   0xa   :  { %20 = vsyncpa [#allocation11], 0 }
   0xb   :  { %22 = vsyncpa [#allocation11 + $0x1], 0  ;;  %s1141_s15 = smov 0   ;;  %s1143_s16 = smov 0  }
   0xc   :  { %s1145_s17 = smov 0   ;;  %s1147_s18 = smov 0  }
   0xd   :  { %s1149_s19 = smov 0   ;;  %s1151_s20 = smov 0  }
   0xe LB: > { %s751_s21 = sadd.s32 4294967295, %s1097_s20   ;;  %s752_s22 = sadd.s32 4294967294, %s1097_s20   ;;  %s1097_s20 = sphi %s1151_s20, %s28_s20   ;;  %s1093_s19 = sphi %s1149_s19, %s1586_s19   ;;  %s1089_s18 = sphi %s1147_s18, %s1585_s18   ;;  %s1085_s17 = sphi %s1145_s17, %s1584_s17   ;;  %s1081_s16 = sphi %s1143_s16, %s1583_s16   ;;  %s1077_s15 = sphi %s1141_s15, %s1582_s15  }
   0xf   : > { %s70_s23 = sadd.s32 1, %s1085_s17  ;;  %p77_p0 = scmp.ne.s32.totalorder %s1085_s17, %s1081_s16 }
  0x10   : > { %p78_p1 = scmp.eq.s32.totalorder %s1097_s20, 0  ;;  %p83_p2 = scmp.ne.s32.totalorder %s1081_s16, %s1077_s15 }
  0x11   : > { %p1179_p3 = scmp.eq.s32.totalorder %s751_s21, 0  ;;  %p137_p4 = scmp.eq.s32.totalorder %s751_s21, 1 }
  0x12   : > { %p79_p5 = por %p78_p1, %p77_p0  ;;  %p143_p6 = scmp.eq.s32.totalorder %s752_s22, 1 }
  0x13   : > { %s1566_s24 = scalar_select %p1179_p3, 1, 0 }
  0x14   : > { %p1185_p7 = por %p1179_p3, %p83_p2  ;;  %p1189_p8 = por %p137_p4, %p77_p0 }
  0x15   : > { %p1193_p9 = por %p143_p6, %p83_p2  ;;  %p753_p10 = scmp.ge.s32.totalorder %s1097_s20, 1 }
  0x16   : > { %s1567_s25 = scalar_select %p1185_p7, 1, 0 }
  0x17   : > { %s1568_s26 = scalar_select %p1189_p8, 1, 0 }
  0x18   : > { %s1569_s27 = scalar_select %p1193_p9, 1, 0 }
  0x19   : > { %p178_p11 = scmp.lt.s32.totalorder %s1097_s20, 3  ;;  %p838_p1 = scmp.lt.s32.totalorder %s1097_s20, 2 }
  0x1a   : > { %s1206_s29 = sand.u32 1, %s1085_s17   ;;  %s40_s5 = sadd.s32 1, %s1093_s19 }
  0x1b   : > { %p1200_p13 = pnand %p753_p10, %p178_p11  ;;  %p1210_p4 = pnand %p838_p1, %p79_p5 }
  0x1c   : > { %s756_s6 = sshll.u32 %s1206_s29, 6  ;;  %p42_p6 = scmp.ge.s32.totalorder %s40_s5, 2 }
  0x1d   : > { %s1570_s28 = scalar_select %p1200_p13, 1, 0 }
  0x1e   : > { %p819_p0 = pneg %p1200_p13  ;;  %s1572_s0 = sld [smem:[#allocation18_spill]] }
  0x20   : > { %p820_p2 = pnand %p819_p0, %p1179_p3 }
  0x22   : > { %p904_p11 = pneg %p820_p2 }
  0x24   : > { %s902_s9 = scalar_lea.hbm %s1572_s0, 64 }
  0x25   : > { %p903_p10 = scmp.ne.s32.totalorder %s1572_s0, %s902_s9  ;;  %p909_p5 = scmp.lt.u32.totalorder %s902_s9, %s1572_s0 }
  0x27   : > { %p905_p12 = pnand %p904_p11, %p903_p10 }
  0x29   : > { %p906_p9 = pneg %p905_p12 }
  0x2b   : > { %p911_p1 = pnand %p909_p5, %p906_p9 }
  0x2d   : > { %914 = shalt.err (!%p911_p1)
}
  0x2e   : > { %s1099_s14 = smov [#allocation2]   ;;  %s1588_s5 = smov (%p42_p6, %s40_s5), 0 }
  0x2f   : > { %822 = dma.hbm_to_smem (!%p820_p2), %s1572_s0, 64, %s1099_s14, [#allocation5]  }
  0x30   : > { %1573 = sst [smem:[#allocation17_spill]] %s1588_s5  ;;  %s803_s7 = sshll.u32 %s1093_s19, 10 }
  0x31   : > { %s65_s8 = ssub.s32 %s1093_s19, %s1588_s5  ;;  %s1574_s1 = sld [smem:[#allocation19_spill]] }
  0x32   : > { %p68_p9 = scmp.eq.s32.totalorder %s65_s8, 0  ;;  %s204_s12 = scalar_lea.vmem [#allocation6], %s756_s6 }
  0x33   : > { %s212_s13 = sshll.u32 %s204_s12, 4  ;;  %s201_s21 = scalar_lea.sflag [#allocation3], %s1206_s29  ;;  %s1240_s13 = int_to_ptr.vmem [resolvable:$true] %s212_s13 }
  0x34   : > { %s1245_s14 = scalar_select %p68_p9, %s1085_s17, %s70_s23  }
  0x35   : > { %p917_p0 = pneg %p1210_p4 }
  0x37   : > { %s1238_s11 = scalar_lea.hbm %s1574_s1, %s803_s7  ;;  %s920_s8 = scalar_lea.hbm %s1574_s1, 2048 }
  0x38   : > { %s915_s22 = scalar_lea.hbm %s1238_s11, 1024  ;;  %p921_p10 = scmp.lt.u32.totalorder %s1238_s11, %s1574_s1 }
  0x39   : > { %p916_p12 = scmp.ne.s32.totalorder %s1238_s11, %s915_s22  ;;  %p922_p11 = scmp.lt.u32.totalorder %s920_s8, %s915_s22 }
  0x3a   : > { %p924_p1 = scmp.lt.u32.totalorder %s915_s22, %s1238_s11 }
  0x3b   : > { %p918_p2 = pnand %p917_p0, %p916_p12  ;;  %p923_p5 = por %p922_p11, %p921_p10 }
  0x3d   : > { %p919_p6 = pneg %p918_p2  ;;  %p925_p9 = por %p924_p1, %p923_p5 }
  0x3f   : > { %p926_p8 = pnand %p925_p9, %p919_p6 }
  0x41   : > { %929 = shalt.err (!%p926_p8)
}
  0x42   : > { %s930_s23 = scalar_lea.vmem %s1240_s13, 1024  ;;  %s1100_s12 = smov [#allocation6]  }
  0x43   : > { %p931_p12 = scmp.ne.s32.totalorder %s1240_s13, %s930_s23  ;;  %s935_s7 = sshll.u32 %s1100_s12, 4  ;;  %s936_s7 = int_to_ptr.vmem [resolvable:$false] %s935_s7 }
  0x44   : > { %s937_s9 = scalar_lea.vmem %s936_s7, 2048  ;;  %p938_p3 = scmp.lt.s32.totalorder %s1240_s13, %s936_s7 }
  0x45   : > { %p933_p2 = pnand %p931_p12, %p917_p0  ;;  %p939_p10 = scmp.lt.s32.totalorder %s937_s9, %s930_s23 }
  0x47   : > { %p934_p7 = pneg %p933_p2  ;;  %p940_p11 = por %p939_p10, %p938_p3 }
  0x49   : > { %p941_p5 = pnand %p940_p11, %p934_p7 }
  0x4b   : > { %944 = shalt.err (!%p941_p5)
}
  0x4c   : > { %s1101_s22 = smov 128   ;;  %s1102_s8 = smov 8  }
  0x4d   : > { %826 = dma.hbm_to_vmem [thread:$0]  (!%p1210_p4), %s1238_s11, 1024, %s1240_s13, %s201_s21, %s1101_s22, %s1101_s22, %s1102_s8  }
  0x4e   : > { %s759_s6 = sshll.u32 %s1206_s29, 3  ;;  %s760_s10 = sshll.u32 %s1093_s19, 7 }
  0x4f   : > { %s1280_s7 = scalar_lea.hbm %s1555_s2, %s760_s10  ;;  %s226_s9 = scalar_lea.vmem [#allocation7], %s759_s6 }
  0x50   : > { %s234_s0 = sshll.u32 %s226_s9, 4  ;;  %s223_s1 = scalar_lea.sflag [#allocation8], %s1206_s29  ;;  %s235_s0 = int_to_ptr.vmem [resolvable:$true] %s234_s0 }
  0x51   : > { %s945_s5 = scalar_lea.hbm %s1280_s7, 128  ;;  %s950_s21 = scalar_lea.hbm %s1555_s2, 256 }
  0x52   : > { %p946_p3 = scmp.ne.s32.totalorder %s1280_s7, %s945_s5  ;;  %p951_p6 = scmp.lt.u32.totalorder %s1280_s7, %s1555_s2 }
  0x53   : > { %p952_p1 = scmp.lt.u32.totalorder %s950_s21, %s945_s5  ;;  %p954_p12 = scmp.lt.u32.totalorder %s945_s5, %s1280_s7 }
  0x54   : > { %p948_p7 = pnand %p946_p3, %p917_p0 }
  0x55   : > { %p953_p9 = por %p952_p1, %p951_p6 }
  0x56   : > { %p949_p8 = pneg %p948_p7 }
  0x57   : > { %p955_p2 = por %p954_p12, %p953_p9 }
  0x59   : > { %p956_p10 = pnand %p955_p2, %p949_p8 }
  0x5b   : > { %959 = shalt.err (!%p956_p10)
}
  0x5c   : > { %s960_s29 = scalar_lea.vmem %s235_s0, 128  ;;  %s1103_s6 = smov [#allocation7]  }
  0x5d   : > { %p961_p11 = scmp.ne.s32.totalorder %s235_s0, %s960_s29  ;;  %s965_s10 = sshll.u32 %s1103_s6, 4  ;;  %s966_s10 = int_to_ptr.vmem [resolvable:$false] %s965_s10 }
  0x5e   : > { %s967_s12 = scalar_lea.vmem %s966_s10, 256  ;;  %p968_p7 = scmp.lt.s32.totalorder %s235_s0, %s966_s10 }
  0x5f   : > { %p963_p5 = pnand %p961_p11, %p917_p0  ;;  %p969_p13 = scmp.lt.s32.totalorder %s967_s12, %s960_s29 }
  0x61   : > { %p964_p3 = pneg %p963_p5  ;;  %p970_p1 = por %p969_p13, %p968_p7 }
  0x63   : > { %p971_p6 = pnand %p970_p1, %p964_p3 }
  0x65   : > { %974 = shalt.err (!%p971_p6)
}
  0x66   : > { %829 = dma.hbm_to_vmem [thread:$0]  (!%p1210_p4), %s1280_s7, 128, %s235_s0, %s223_s1  }
  0x67   : > { %p1575_p8 = scmp.ne.s32.totalorder %s1570_s28, 0 }
  0x68   : > { %p1576_p9 = scmp.ne.s32.totalorder (!%p1575_p8), %s1566_s24, 0 }
  0x69   : > { %243 = sbr.rel (%p1575_p8) target bundleno = 430 (0x1ae), region = 32 }
  0x70   : > { %1056 = dma.done.wait (%p1576_p9), [#allocation5], 64  }
  0x71   : > { %1058 = vsyncadd (%p1576_p9), [#allocation5], 4294967232  ;;  %s1309_s5 = sand.u32 1, %s1081_s16   ;;  %p1577_p13 = scmp.ne.s32.totalorder %s1567_s25, 0 }
  0x72   : > { %s763_s23 = sshll.u32 %s1309_s5, 6  ;;  %s250_s9 = scalar_lea.sflag [#allocation3], %s1309_s5 }
  0x73   : > { %s1313_s30 = scalar_lea.vmem [#allocation6], %s763_s23 }
  0x74   : > { %1060 = dma.done.wait (%p1577_p13), %s250_s9, 1024  }
  0x75   : > { %1062 = vsyncadd (%p1577_p13), %s250_s9, 4294966272  ;;  %s764_s0 = sshll.u32 %s1309_s5, 3  ;;  %s259_s1 = scalar_lea.sflag [#allocation8], %s1309_s5 }
  0x76   : > { %s262_s24 = scalar_lea.vmem [#allocation7], %s764_s0 }
  0x77   : > { %1064 = dma.done.wait (%p1577_p13), %s259_s1, 128  }
  0x78   : > { %1066 = vsyncadd (%p1577_p13), %s259_s1, 4294967168 }
  0x79   : > { %267 = sfence }
  0x7a   : > { %s1325_s28 = sld [smem:[#allocation2 + $0x101]]  ;;  %s1329_s11 = sld [smem:[#allocation2 + $0x2]]  ;;  %v1337_v0 = vld [vmem:[%s262_s24] sm:$0xff]  ;;  %v766_v17 = vld [vmem:[%s1313_s30 + $0x10] sm:$0xff]  ;;  %v767_v24 = vld [vmem:[%s1313_s30 + $0x18] sm:$0xff]  ;;  %vm388_vm0 = vcmask 130048  }
  0x7b   : > { %s1327_s7 = sld [smem:[#allocation2 + $0x1]]  ;;  %s1333_s21 = sld [smem:[#allocation2 + $0x102]]  ;;  %v765_v16 = vld [vmem:[%s1313_s30 + $0x8] sm:$0xff]  ;;  %v299_v26 = vld [vmem:[%s1313_s30] sm:$0xff]  ;;  %v770_v54 = vld [vmem:[%s1313_s30 + $0x30] sm:$0xff] }
  0x7c   : > { %s1331_s13 = sld [smem:[#allocation2 + $0x81]]  ;;  %s1335_s22 = sld [smem:[#allocation2 + $0x82]]  ;;  %v768_v36 = vld [vmem:[%s1313_s30 + $0x20] sm:$0xff]  ;;  %v769_v44 = vld [vmem:[%s1313_s30 + $0x28] sm:$0xff] }
  0x7d   : > { %s1340_s25 = sld [smem:[#allocation2 + $0x83]]  ;;  %s1104_s29 = smov 1  }
  0x7e   : > { %s1345_s8 = sld [smem:[#allocation2 + $0x3]]  ;;  %s1352_s6 = sld [smem:[#allocation2 + $0x4]] }
  0x7f   : > { %s1355_s10 = sld [smem:[#allocation2 + $0x103]]  ;;  %s1105_s12 = smov 2  }
  0x80   : > { %v482_v1 = vstv %s1325_s28  ;;  %v329_v4 = vstv %s1329_s11  ;;  %s1360_s23 = sld [smem:[#allocation2 + $0x104]]  ;;  %s1365_s0 = sld [smem:[#allocation2 + $0x100]] }
  0x81   : > { %v485_v2 = vmul.f32 %v482_v1, %v1337_v0  ;;  %v319_v3 = vstv %s1327_s7  ;;  %v332_v6 = vmul.f32 %v329_v4, %v1337_v0  ;;  %v492_v9 = vstv %s1333_s21  ;;  %s1362_s9 = sld [smem:[#allocation2 + $0x84]]  ;;  %s1367_s1 = sld [smem:[#allocation2]] }
  0x82   : > { %v322_v5 = vmul.f32 %v319_v3, %v1337_v0  ;;  %v400_v7 = vstv %s1331_s13  ;;  %v410_v10 = vstv %s1335_s22  ;;  %v495_v11 = vmul.f32 %v492_v9, %v1337_v0  ;;  %s1370_s24 = sld [smem:[#allocation2 + $0x85]]  ;;  %s1372_s28 = sld [smem:[#allocation2 + $0x80]] }
  0x83   : > { %487 = vrot.lane.b32.xlu1 %v485_v2, %s1104_s29  ;;  %v403_v8 = vmul.f32 %v400_v7, %v1337_v0  ;;  %v413_v12 = vmul.f32 %v410_v10, %v1337_v0  ;;  %v420_v13 = vstv %s1340_s25  ;;  %s1378_s7 = sld [smem:[#allocation2 + $0x5]]  ;;  %v483_v21 = vmul.f32 %v765_v16, %v482_v1  ;;  %s1106_s11 = smov 3  }
  0x84   : > { %324 = vrot.lane.b32.xlu0 %v322_v5, %s1104_s29  ;;  %v339_v14 = vstv %s1345_s8  ;;  %v423_v15 = vmul.f32 %v420_v13, %v1337_v0  ;;  %v349_v19 = vstv %s1352_s6  ;;  %v320_v22 = vmul.f32 %v765_v16, %v319_v3  ;;  %s1383_s13 = sld [smem:[#allocation2 + $0x6]]  ;;  %s1385_s21 = sld [smem:[#allocation2 + $0x105]] }
  0x85   : > { %v342_v18 = vmul.f32 %v339_v14, %v1337_v0  ;;  %v502_v20 = vstv %s1355_s10  ;;  %v330_v23 = vmul.f32 %v766_v17, %v329_v4  ;;  %v352_v25 = vmul.f32 %v349_v19, %v1337_v0  ;;  %s1391_s22 = sld [smem:[#allocation2 + $0x106]]  ;;  %s1107_s8 = smov 4  }
  0x86   : > { %v401_v27 = vmul.f32 %v765_v16, %v400_v7  ;;  %v505_v28 = vmul.f32 %v502_v20, %v1337_v0  ;;  %v512_v29 = vstv %s1360_s23  ;;  %v493_v31 = vmul.f32 %v766_v17, %v492_v9  ;;  %s1393_s25 = sld [smem:[#allocation2 + $0x86]]  ;;  %s1410_s6 = sld [smem:[#allocation2 + $0x107]] }
  0x87   : > { %334 = vrot.lane.b32.xlu1 %v332_v6, %s1105_s12  ;;  %v430_v30 = vstv %s1362_s9  ;;  %v411_v32 = vmul.f32 %v766_v17, %v410_v10  ;;  %v478_v33 = vstv %s1365_s0  ;;  %v315_v34 = vstv %s1367_s1  ;;  %s1414_s10 = sld [smem:[#allocation2 + $0x87]]  ;;  %s1110_s23 = smov 7  }
  0x88   : > { %405 = vrot.lane.b32.xlu0 %v403_v8, %s1104_s29  ;;  %v340_v35 = vmul.f32 %v767_v24, %v339_v14  ;;  %v503_v37 = vmul.f32 %v767_v24, %v502_v20  ;;  %v479_v38 = vmul.f32 %v478_v33, %v299_v26  ;;  %v316_v39 = vmul.f32 %v315_v34, %v299_v26  ;;  %s1405_s29 = sld [smem:[#allocation2 + $0x7]]  ;;  %v771_v8 = vld [vmem:[%s1313_s30 + $0x38] sm:$0xff]  ;;  %s1109_s30 = smov 6  }
  0x89   : > { %v515_v40 = vmul.f32 %v512_v29, %v1337_v0  ;;  %v433_v41 = vmul.f32 %v430_v30, %v1337_v0  ;;  %v440_v42 = vstv %s1370_s24  ;;  %v396_v43 = vstv %s1372_s28  ;;  %s804_s9 = smul.u32 24, %s1309_s5  ;;  %p1578_p0 = scmp.ne.s32.totalorder %s1568_s26, 0 }
  0x8a   : > { %v359_v45 = vstv %s1378_s7  ;;  %v484_v46 = vadd.f32 %v483_v21, %v479_v38  ;;  %v321_v47 = vadd.f32 %v320_v22, %v316_v39  ;;  %v397_v48 = vmul.f32 %v396_v43, %v299_v26  ;;  %s805_s0 = smul.u32 384, %s1089_s18 }
  0x8b   : > { %497 = vrot.lane.b32.xlu1 %v495_v11, %s1105_s12  ;;  %v421_v49 = vmul.f32 %v767_v24, %v420_v13  ;;  %v350_v50 = vmul.f32 %v768_v36, %v349_v19  ;;  %v513_v51 = vmul.f32 %v768_v36, %v512_v29  ;;  %v431_v52 = vmul.f32 %v768_v36, %v430_v30  ;;  %s290_s24 = scalar_lea.vmem [#allocation9], %s804_s9 }
  0x8c   : > { %415 = vrot.lane.b32.xlu0 %v413_v12, %s1105_s12  ;;  %v443_v53 = vmul.f32 %v440_v42, %v1337_v0  ;;  %v494_v55 = vadd.f32 %v493_v31, %v484_v46  ;;  %v331_v56 = vadd.f32 %v330_v23, %v321_v47  ;;  %v402_v57 = vadd.f32 %v401_v27, %v397_v48  ;;  %s1108_s12 = smov 5   ;;  %s579_s1 = sshll.u32 %s290_s24, 4  ;;  %s1452_s1 = int_to_ptr.vmem [resolvable:$true] %s579_s1 }
  0x8d   : > { %v360_v58 = vmul.f32 %v769_v44, %v359_v45  ;;  %v362_v59 = vmul.f32 %v359_v45, %v1337_v0  ;;  %v369_v60 = vstv %s1383_s13  ;;  %v522_v61 = vstv %s1385_s21  ;;  %s560_s13 = scalar_lea.sflag [#allocation4], %s1309_s5  ;;  %s975_s21 = scalar_lea.vmem %s1452_s1, 384 }
  0x8e   : > { %v523_v62 = vmul.f32 %v769_v44, %v522_v61  ;;  %v504_v63 = vadd.f32 %v503_v37, %v494_v55  ;;  %v341_v1 = vadd.f32 %v340_v35, %v331_v56  ;;  %v412_v2 = vadd.f32 %v411_v32, %v402_v57  ;;  %p976_p4 = scmp.ne.s32.totalorder %s1452_s1, %s975_s21 }
  0x8f   : > { %425 = vrot.lane.b32.xlu1 %v423_v15, %s1106_s11  ;;  %v441_v3 = vmul.f32 %v769_v44, %v440_v42  ;;  %v370_v4 = vmul.f32 %v770_v54, %v369_v60  ;;  %v532_v5 = vstv %s1391_s22  ;;  %v450_v6 = vstv %s1393_s25  ;;  %s1111_s22 = smov [#allocation9]  }
  0x90   : > { %344 = vrot.lane.b32.xlu0 %v342_v18, %s1106_s11  ;;  %v533_v7 = vmul.f32 %v770_v54, %v532_v5  ;;  %v514_v9 = vadd.f32 %v513_v51, %v504_v63  ;;  %v351_v10 = vadd.f32 %v350_v50, %v341_v1  ;;  %v422_v11 = vadd.f32 %v421_v49, %v412_v2  ;;  %p977_p12 = pnand %p976_p4, %p1578_p0  ;;  %s979_s25 = sshll.u32 %s1111_s22, 4  ;;  %s980_s25 = int_to_ptr.vmem [resolvable:$false] %s979_s25 }
  0x91   : > { %v372_v12 = vmul.f32 %v369_v60, %v1337_v0  ;;  %v525_v13 = vmul.f32 %v522_v61, %v1337_v0  ;;  %v451_v14 = vmul.f32 %v770_v54, %v450_v6  ;;  %v379_v15 = vstv %s1405_s29  ;;  %p982_p10 = scmp.lt.s32.totalorder %s1452_s1, %s980_s25 }
  0x92   : > { %v542_v16 = vstv %s1410_s6  ;;  %v524_v17 = vadd.f32 %v523_v62, %v514_v9  ;;  %v361_v18 = vadd.f32 %v360_v58, %v351_v10  ;;  %v432_v19 = vadd.f32 %v431_v52, %v422_v11  ;;  %p978_p2 = pneg %p977_p12 }
  0x93   : > { %354 = vrot.lane.b32.xlu1 %v352_v25, %s1107_s8  ;;  %v460_v20 = vstv %s1414_s10  ;;  %v380_v21 = vmul.f32 %v771_v8, %v379_v15  ;;  %v543_v22 = vmul.f32 %v771_v8, %v542_v16  ;;  %v535_v27 = vmul.f32 %v532_v5, %v1337_v0 }
  0x94   : > { %507 = vrot.lane.b32.xlu0 %v505_v28, %s1106_s11  ;;  %v461_v23 = vmul.f32 %v771_v8, %v460_v20  ;;  %v534_v24 = vadd.f32 %v533_v7, %v524_v17  ;;  %v371_v25 = vadd.f32 %v370_v4, %v361_v18  ;;  %v442_v26 = vadd.f32 %v441_v3, %v432_v19  ;;  %s1459_s11 = scalar_lea.hbm %s1556_s3, %s805_s0 }
  0x95   : > { %v453_v28 = vmul.f32 %v450_v6, %v1337_v0  ;;  %v463_v35 = vmul.f32 %v460_v20, %v1337_v0  ;;  %v382_v36 = vmul.f32 %v379_v15, %v1337_v0  ;;  %v545_v37 = vmul.f32 %v542_v16, %v1337_v0 }
  0x96   : > { %v452_v29 = vadd.f32 %v451_v14, %v442_v26  ;;  %v381_v30 = vadd.f32 %v380_v21, %v371_v25  ;;  %v544_v31 = vadd.f32 %v543_v22, %v534_v24  ;;  %v398_v50 = vmul.f32 %v396_v43, %v1337_v0 }
  0x97   : > { %517 = vrot.lane.b32.xlu1 %v515_v40, %s1107_s8  ;;  %v317_v52 = vmul.f32 %v315_v34, %v1337_v0  ;;  %v480_v56 = vmul.f32 %v478_v33, %v1337_v0 }
  0x98   : > { %435 = vrot.lane.b32.xlu0 %v433_v41, %s1107_s8  ;;  %v462_v32 = vadd.f32 %v461_v23, %v452_v29  ;;  %389 = vst.msk [vmem:[%s290_s24] sm:$0xff] %vm388_vm0, %v381_v30  ;;  %797 = vst.msk [vmem:[%s290_s24 + $0x10] sm:$0xff] %vm388_vm0, %v544_v31  ;;  %s981_s8 = scalar_lea.vmem %s980_s25, 768 }
  0x99   : > { %p983_p11 = scmp.lt.s32.totalorder %s981_s8, %s975_s21 }
  0x9a   : > { %787 = vst.msk [vmem:[%s290_s24 + $0x8] sm:$0xff] %vm388_vm0, %v462_v32 }
  0x9b   : > { %445 = vrot.lane.b32.xlu1 %v443_v53, %s1108_s12  ;;  %p984_p5 = por %p983_p11, %p982_p10 }
  0x9c   : > { %364 = vrot.lane.b32.xlu0 %v362_v59, %s1108_s12 }
  0x9d   : > { %p985_p3 = pnand %p984_p5, %p978_p2 }
  0x9f   : > { %374 = vrot.lane.b32.xlu1 %v372_v12, %s1109_s30 }
  0xa0   : > { %527 = vrot.lane.b32.xlu0 %v525_v13, %s1108_s12 }
  0xa3   : > { %537 = vrot.lane.b32.xlu1 %v535_v27, %s1109_s30 }
  0xa4   : > { %455 = vrot.lane.b32.xlu0 %v453_v28, %s1109_s30 }
  0xa7   : > { %465 = vrot.lane.b32.xlu1 %v463_v35, %s1110_s23 }
  0xa8   : > { %384 = vrot.lane.b32.xlu0 %v382_v36, %s1110_s23 }
  0xac   : > { %547 = vrot.lane.b32.xlu0 %v545_v37, %s1110_s23 }
  0xf5   : > { %v488_v38 = vpop.permute.xlu1 %487 }
  0xf6   : > { %v325_v39 = vpop.permute.xlu0 %324  ;;  %v490_v0 = vadd.f32 %v488_v38, %v480_v56 }
  0xf7   : > { %v327_v57 = vadd.f32 %v325_v39, %v317_v52 }
  0xf9   : > { %v335_v40 = vpop.permute.xlu1 %334 }
  0xfa   : > { %v406_v41 = vpop.permute.xlu0 %405  ;;  %v337_v34 = vadd.f32 %v335_v40, %v327_v57 }
  0xfb   : > { %v408_v54 = vadd.f32 %v406_v41, %v398_v50 }
  0xfd   : > { %v498_v42 = vpop.permute.xlu1 %497 }
  0xfe   : > { %v416_v44 = vpop.permute.xlu0 %415  ;;  %v500_v62 = vadd.f32 %v498_v42, %v490_v0 }
  0xff   : > { %v418_v58 = vadd.f32 %v416_v44, %v408_v54 }
 0x101   : > { %v426_v45 = vpop.permute.xlu1 %425 }
 0x102   : > { %v345_v46 = vpop.permute.xlu0 %344  ;;  %v428_v59 = vadd.f32 %v426_v45, %v418_v58 }
 0x103   : > { %v347_v33 = vadd.f32 %v345_v46, %v337_v34 }
 0x105   : > { %v355_v47 = vpop.permute.xlu1 %354 }
 0x106   : > { %v508_v48 = vpop.permute.xlu0 %507  ;;  %v357_v63 = vadd.f32 %v355_v47, %v347_v33 }
 0x109   : > { %v1434_v49 = vpop.permute.xlu1 %517 }
 0x10a   : > { %v436_v51 = vpop.permute.xlu0 %435 }
 0x10b   : > { %v438_v61 = vadd.f32 %v436_v51, %v428_v59 }
 0x10d   : > { %v446_v53 = vpop.permute.xlu1 %445 }
 0x10e   : > { %v365_v55 = vpop.permute.xlu0 %364  ;;  %v448_v2 = vadd.f32 %v446_v53, %v438_v61 }
 0x111   : > { %v375_v43 = vpop.permute.xlu1 %374 }
 0x112   : > { %v528_v60 = vpop.permute.xlu0 %527 }
 0x115   : > { %v538_v1 = vpop.permute.xlu1 %537 }
 0x116   : > { %v456_v3 = vpop.permute.xlu0 %455 }
 0x117   : > { %988 = shalt.err (!%p985_p3)
}
 0x118   : > { %s989_s29 = scalar_lea.hbm %s1459_s11, 384  ;;  %s993_s12 = scalar_lea.hbm %s1556_s3, 768 }
 0x119   : > { %p990_p7 = scmp.ne.s32.totalorder %s1459_s11, %s989_s29  ;;  %p994_p8 = scmp.lt.u32.totalorder %s1459_s11, %s1556_s3 }
 0x11a   : > { %p995_p9 = scmp.lt.u32.totalorder %s993_s12, %s989_s29  ;;  %p997_p4 = scmp.lt.u32.totalorder %s989_s29, %s1459_s11 }
 0x11b   : > { %p991_p1 = pnand %p990_p7, %p1578_p0 }
 0x11c   : > { %p996_p13 = por %p995_p9, %p994_p8 }
 0x11d   : > { %p992_p6 = pneg %p991_p1 }
 0x11e   : > { %p998_p12 = por %p997_p4, %p996_p13 }
 0x120   : > { %p999_p2 = pnand %p998_p12, %p992_p6 }
 0x122   : > { %1002 = shalt.err (!%p999_p2)
}
 0x123   : > { %s1112_s24 = smov 128   ;;  %s1113_s28 = smov 8   ;;  %v510_v4 = vadd.f32 %v508_v48, %v500_v62  ;;  %v367_v5 = vadd.f32 %v365_v55, %v357_v63  ;;  %v458_v6 = vadd.f32 %v456_v3, %v448_v2  ;;  %v466_v9 = vpop.permute.xlu1 %465  ;;  %v385_v11 = vpop.permute.xlu0 %384 }
 0x124   : > { %815 = dma.vmem_to_hbm [thread:$0]  (%p1578_p0), %s1452_s1, 384, %s1459_s11, %s560_s13, %s1112_s24, %s1112_s24, %s1113_s28  }
 0x125   : > { %v520_v7 = vadd.f32 %v1434_v49, %v510_v4  ;;  %v377_v8 = vadd.f32 %v375_v43, %v367_v5  ;;  %v468_v10 = vadd.f32 %v466_v9, %v458_v6  ;;  %s1114_s7 = smov 121   ;;  %s297_s1 = scalar_lea.vmem [#allocation10], %s804_s9 }
 0x126   : > { %s596_s11 = sshll.u32 %s297_s1, 4  ;;  %s1500_s22 = scalar_lea.hbm %s1557_s4, %s805_s0  ;;  %s1493_s11 = int_to_ptr.vmem [resolvable:$true] %s596_s11 }
 0x127   : > { %v530_v12 = vadd.f32 %v528_v60, %v520_v7  ;;  %v387_v13 = vadd.f32 %v385_v11, %v377_v8  ;;  %472 = vrot.lane.b32.xlu0 %v468_v10, %s1114_s7  ;;  %v548_v15 = vpop.permute.xlu0 %547  ;;  %s565_s9 = scalar_lea.sflag [#allocation11], %s1309_s5  ;;  %s1003_s25 = scalar_lea.vmem %s1493_s11, 384 }
 0x128   : > { %p1004_p10 = scmp.ne.s32.totalorder %s1493_s11, %s1003_s25  ;;  %s1115_s8 = smov [#allocation10]  }
 0x129   : > { %v540_v14 = vadd.f32 %v538_v1, %v530_v12  ;;  %391 = vrot.lane.b32.xlu1 %v387_v13, %s1114_s7  ;;  %s1007_s29 = sshll.u32 %s1115_s8, 4  ;;  %s1008_s29 = int_to_ptr.vmem [resolvable:$false] %s1007_s29 }
 0x12a   : > { %p1005_p11 = pnand %p1004_p10, %p1578_p0  ;;  %s1009_s18 = scalar_lea.vmem %s1008_s29, 768 }
 0x12b   : > { %v550_v16 = vadd.f32 %v548_v15, %v540_v14  ;;  %p1010_p3 = scmp.lt.s32.totalorder %s1493_s11, %s1008_s29  ;;  %p1011_p7 = scmp.lt.s32.totalorder %s1009_s18, %s1003_s25 }
 0x12c   : > { %p1006_p5 = pneg %p1005_p11 }
 0x12d   : > { %554 = vrot.lane.b32.xlu1 %v550_v16, %s1114_s7  ;;  %p1012_p1 = por %p1011_p7, %p1010_p3 }
 0x12f   : > { %p1013_p6 = pnand %p1012_p1, %p1006_p5 }
 0x199   : > { %v473_v17 = vpop.permute.xlu0 %472 }
 0x19a   : > { %788 = vst.msk [vmem:[%s297_s1 + $0x8] sm:$0xff] %vm388_vm0, %v473_v17 }
 0x19b   : > { %v392_v18 = vpop.permute.xlu1 %391 }
 0x19c   : > { %394 = vst.msk [vmem:[%s297_s1] sm:$0xff] %vm388_vm0, %v392_v18 }
 0x19f   : > { %v555_v19 = vpop.permute.xlu1 %554 }
 0x1a0   : > { %798 = vst.msk [vmem:[%s297_s1 + $0x10] sm:$0xff] %vm388_vm0, %v555_v19 }
 0x1a1   : > { %1016 = shalt.err (!%p1013_p6)
}
 0x1a2   : > { %s1017_s0 = scalar_lea.hbm %s1500_s22, 384  ;;  %s1021_s12 = scalar_lea.hbm %s1557_s4, 768 }
 0x1a3   : > { %p1018_p8 = scmp.ne.s32.totalorder %s1500_s22, %s1017_s0  ;;  %p1022_p4 = scmp.lt.u32.totalorder %s1500_s22, %s1557_s4 }
 0x1a4   : > { %p1023_p12 = scmp.lt.u32.totalorder %s1021_s12, %s1017_s0  ;;  %p1025_p10 = scmp.lt.u32.totalorder %s1017_s0, %s1500_s22 }
 0x1a5   : > { %p1019_p9 = pnand %p1018_p8, %p1578_p0 }
 0x1a6   : > { %p1024_p2 = por %p1023_p12, %p1022_p4 }
 0x1a7   : > { %p1020_p13 = pneg %p1019_p9 }
 0x1a8   : > { %p1026_p11 = por %p1025_p10, %p1024_p2 }
 0x1aa   : > { %p1027_p5 = pnand %p1026_p11, %p1020_p13 }
 0x1ac   : > { %1030 = shalt.err (!%p1027_p5)
}
 0x1ad   : > { %816 = dma.vmem_to_hbm [thread:$0]  (%p1578_p0), %s1493_s11, 384, %s1500_s22, %s565_s9, %s1112_s24, %s1112_s24, %s1113_s28  }
 0x1ae PF: > { %s611_s7 = sand.u32 1, %s1077_s15   ;;  %p1579_p3 = scmp.ne.s32.totalorder %s1569_s27, 0 }
 0x1af   : > { %p1580_p7 = scmp.ge.s32.totalorder %s1097_s20, 2  ;;  %s612_s1 = scalar_lea.sflag [#allocation4], %s611_s7 }
 0x1b1   : > { %p831_p1 = pnand %p1580_p7, %p1579_p3 }
 0x1b3   : > { %1068 = dma.done.wait (!%p831_p1), %s612_s1, 384  }
 0x1b4   : > { %1070 = vsyncadd (!%p831_p1), %s612_s1, 4294966912  ;;  %s621_s26 = scalar_lea.sflag [#allocation11], %s611_s7 }
 0x1b5   : > { %1072 = dma.done.wait (!%p831_p1), %s621_s26, 384  }
 0x1b6   : > { %1074 = vsyncadd (!%p831_p1), %s621_s26, 4294966912  ;;  %s28_s20 = sadd.s32 1, %s1097_s20   ;;  %s1581_s5 = sld [smem:[#allocation17_spill]] }
 0x1b7   : > { %p25_p6 = scmp.ge.s32.totalorder %s28_s20, 4   ;;  %s1582_s15 = smov %s1081_s16 }
 0x1b8   : > { %s1583_s16 = smov %s1085_s17  ;;  %s1584_s17 = smov %s1245_s14 }
 0x1b9   : > { %s1585_s18 = smov %s1093_s19  ;;  %27 = sbr.rel (!%p25_p6) target bundleno = 14 (0xe), region = 123 }
 0x1bc   : > { %s1586_s19 = smov %s1581_s5 }
 0x1c0   :  { %626 = vsyncpa [#allocation3], 1 }
 0x1c1   :  { %628 = vsyncpa [#allocation3 + $0x1], 1 }
 0x1c2   :  { %629 = vsyncpa [#allocation8], 1 }
 0x1c3   :  { %631 = vsyncpa [#allocation8 + $0x1], 1 }
 0x1c4   :  { %632 = vsyncpa [#allocation4], 1 }
 0x1c5   :  { %634 = vsyncpa [#allocation4 + $0x1], 1 }
 0x1c6   :  { %635 = vsyncpa [#allocation11], 1 }
 0x1c7   :  { %637 = vsyncpa [#allocation11 + $0x1], 1 }
 0x1c8   :  { %638 = vsyncpa [#allocation5], 1 }
 0x1c9   :  { %640 = vsyncpa [#allocation5 + $0x1], 1 }

</bundles_post_ra>
